<compile_context>
chip_gen: v6e
topology: v6e:2x2x1
jax: 0.10.0
libtpu: 0.0.40
codegen_flags: <defaults>
</compile_context>

<pallas_src>
import jax
import jax.numpy as jnp
from jax.experimental import pallas as pl
from jax.experimental.pallas import tpu as pltpu


def _num_batch_steps(n: int) -> int:
    """2 fat 'parallel' steps on dual-TensorCore chips (v7x), else 1 fat step."""
    try:
        kind = jax.devices()[0].device_kind.lower()
    except Exception:
        kind = ""
    if n >= 2 and n % 2 == 0 and ("v7" in kind or "7x" in kind):
        return 2
    return 1


def conv_instancenorm_relu(x, weight, bias):
    """x: (N, Cin, H, W) f32; weight: (Cout, Cin, 3, 3) f32; bias: (Cout,) f32."""
    N, Cin, H, W = x.shape
    Cout = weight.shape[0]
    assert H >= 2 and W >= 2, "ReflectionPad2d(1) requires H, W >= 2"

    Wp = W + 2                  # padded row width
    P = (H + 2) * Wp            # flattened padded-image length
    L = H * Wp                  # matmul columns = padded-width output rows
    P2 = P + 2                  # +2 tail so the largest tap shift never reads OOB

    # ---- wrapper-side glue (small, input-sized rearrangements) -------------
    # ReflectionPad2d(1), flatten spatially, 2-element tail pad.  Stays f32;
    # the f32->bf16 cast happens in VMEM inside the kernel.
    xpad = jnp.pad(x, ((0, 0), (0, 0), (1, 1), (1, 1)), mode="reflect")
    xflat = jnp.pad(xpad.reshape(N, Cin, P), ((0, 0), (0, 0), (0, P2 - P)))

    # Tap-major weights: w_taps[t] = weight[:, :, kh, kw] with t = kh*3 + kw.
    w_taps = weight.transpose(2, 3, 0, 1).reshape(9, Cout, Cin).astype(jnp.bfloat16)
    b_col = bias.reshape(Cout, 1).astype(jnp.float32)

    # ---- grid: <=2 fat "parallel" batch steps -------------------------------
    n_steps = _num_batch_steps(N)
    NB = N // n_steps

    def kernel(x_ref, w_ref, b_ref, o_ref):
        # x_ref: (NB, Cin, P2) f32   w_ref: (9, Cout, Cin) bf16
        # b_ref: (Cout, 1)  f32      o_ref: (NB, Cout, L)  f32
        for nb in range(NB):                      # static unroll (NB <= 2 here)
            acc = jnp.zeros((Cout, L), jnp.float32)
            for t in range(9):                    # fused im2col: 9 shifted taps
                kh, kw = divmod(t, 3)
                off = kh * Wp + kw                # static lane offset
                slab = x_ref[nb, :, off:off + L].astype(jnp.bfloat16)  # (Cin, L)
                acc = acc + jnp.dot(w_ref[t], slab,
                                    preferred_element_type=jnp.float32)
            acc = acc + b_ref[...]                # lane-broadcast bias
            o_ref[nb] = jnp.maximum(acc, 0.0).astype(o_ref.dtype)

    flops = 2 * N * Cout * (9 * Cin) * L
    bytes_accessed = (xflat.size * 4 + w_taps.size * 2 + b_col.size * 4
                      + N * Cout * L * 4)

    out_flat = pl.pallas_call(
        kernel,
        out_shape=jax.ShapeDtypeStruct((N, Cout, L), jnp.float32),
        grid=(n_steps,),
        in_specs=[
            pl.BlockSpec((NB, Cin, P2), lambda s: (s, 0, 0)),    # padded input
            pl.BlockSpec((9, Cout, Cin), lambda s: (0, 0, 0)),   # weights (VMEM)
            pl.BlockSpec((Cout, 1), lambda s: (0, 0)),           # bias (VMEM)
        ],
        out_specs=pl.BlockSpec((NB, Cout, L), lambda s: (s, 0, 0)),
        compiler_params=pltpu.CompilerParams(
            dimension_semantics=("parallel",)),
        cost_estimate=pl.CostEstimate(flops=flops, transcendentals=0,
                                      bytes_accessed=bytes_accessed),
    )(xflat, w_taps, b_col)

    # Strip the 2 padded-width garbage columns per row, restore NCHW layout.
    out = out_flat.reshape(N, Cout, H, Wp)[..., :W]
    return out.astype(x.dtype)


if __name__ == "__main__":
    key = jax.random.PRNGKey(0)
    k1, k2, k3 = jax.random.split(key, 3)

    N, Cin, Cout, H, W = 2, 4, 8, 16, 16
    x = jax.random.normal(k1, (N, Cin, H, W), dtype=jnp.float32)

    # Same init family as nn.Conv2d default: U(-1/sqrt(fan_in), 1/sqrt(fan_in)).
    fan_in = Cin * 3 * 3
    bound = 1.0 / (fan_in ** 0.5)
    weight = jax.random.uniform(k2, (Cout, Cin, 3, 3), jnp.float32, -bound, bound)
    bias = jax.random.uniform(k3, (Cout,), jnp.float32, -bound, bound)

    out = conv_instancenorm_relu(x, weight, bias)
    out = jax.block_until_ready(out)
    assert out.shape == (N, Cout, H, W)

    # Reference A: same math as the kernel (bf16-quantized operands, f32 acc).
    xq = x.astype(jnp.bfloat16).astype(jnp.float32)
    wq = weight.astype(jnp.bfloat16).astype(jnp.float32)
    xpad_q = jnp.pad(xq, ((0, 0), (0, 0), (1, 1), (1, 1)), mode="reflect")
    ref_q = jax.lax.conv_general_dilated(
        xpad_q, wq, window_strides=(1, 1), padding="VALID",
        dimension_numbers=("NCHW", "OIHW", "NCHW"))
    ref_q = jnp.maximum(ref_q + bias[None, :, None, None], 0.0)
    assert jnp.allclose(out, ref_q, atol=1e-3, rtol=1e-3), "mismatch vs bf16 ref"

    # Reference B: true-f32 PyTorch semantics.  The looser tolerance documents
    # the bf16 operand quantization used to hit the full-rate MXU path.
    xpad_f = jnp.pad(x, ((0, 0), (0, 0), (1, 1), (1, 1)), mode="reflect")
    ref_f = jax.lax.conv_general_dilated(
        xpad_f, weight, window_strides=(1, 1), padding="VALID",
        dimension_numbers=("NCHW", "OIHW", "NCHW"),
        precision=jax.lax.Precision.HIGHEST)
    ref_f = jnp.maximum(ref_f + bias[None, :, None, None], 0.0)
    assert jnp.allclose(out, ref_f, atol=5e-2, rtol=5e-2), "mismatch vs f32 ref"

    print("KERNEL_OK")
</pallas_src>

<mosaic_0001>
module attributes {stable_mosaic.version = 11 : i64} {
  func.func @kernel(%arg0: i32, %arg1: memref<2x4x326xf32, #tpu.memory_space<vmem>>, %arg2: memref<9x8x4xbf16, #tpu.memory_space<vmem>>, %arg3: memref<8x1xf32, #tpu.memory_space<vmem>>, %arg4: memref<2x8x288xf32, #tpu.memory_space<vmem>>) attributes {dimension_semantics = [#tpu.dimension_semantics<parallel>], iteration_bounds = array<i64: 1>, scalar_prefetch = 0 : i64, scratch_operands = 0 : i64, tpu.core_type = #tpu.core_type<tc>, window_params = [{transform_indices = @transform_0, window_bounds = array<i64: 2, 4, 326>}, {pipeline_mode = #tpu.pipeline_mode<synchronous>, transform_indices = @transform_1, window_bounds = array<i64: 9, 8, 4>}, {pipeline_mode = #tpu.pipeline_mode<synchronous>, transform_indices = @transform_2, window_bounds = array<i64: 8, 1>}, {transform_indices = @transform_3, window_bounds = array<i64: 2, 8, 288>}]} {
    %cst = arith.constant 0.000000e+00 : f32
    %0 = vector.broadcast %cst : f32 to vector<8x288xf32>
    %c0 = arith.constant 0 : index
    %c0_0 = arith.constant 0 : index
    %c0_1 = arith.constant 0 : index
    %1 = vector.load %arg1[%c0, %c0_0, %c0_1] : memref<2x4x326xf32, #tpu.memory_space<vmem>>, vector<1x4x288xf32>
    %2 = vector.shape_cast %1 : vector<1x4x288xf32> to vector<4x288xf32>
    %3 = arith.truncf %2 : vector<4x288xf32> to vector<4x288xbf16>
    %c0_2 = arith.constant 0 : index
    %c0_3 = arith.constant 0 : index
    %c0_4 = arith.constant 0 : index
    %4 = vector.load %arg2[%c0_2, %c0_3, %c0_4] : memref<9x8x4xbf16, #tpu.memory_space<vmem>>, vector<1x8x4xbf16>
    %5 = vector.shape_cast %4 : vector<1x8x4xbf16> to vector<8x4xbf16>
    %cst_5 = arith.constant dense<0.000000e+00> : vector<8x288xf32>
    %6 = tpu.matmul %5, %3, %cst_5 {dimension_numbers = #tpu.dot_dimension_numbers<[1], [0], [0], [1], [0, 0, 1, 1], [], []>} : vector<8x4xbf16>, vector<4x288xbf16>, vector<8x288xf32> -> vector<8x288xf32>
    %7 = arith.addf %0, %6 : vector<8x288xf32>
    %c0_6 = arith.constant 0 : index
    %c0_7 = arith.constant 0 : index
    %c1 = arith.constant 1 : index
    %8 = vector.load %arg1[%c0_6, %c0_7, %c1] : memref<2x4x326xf32, #tpu.memory_space<vmem>>, vector<1x4x288xf32>
    %9 = vector.shape_cast %8 : vector<1x4x288xf32> to vector<4x288xf32>
    %10 = arith.truncf %9 : vector<4x288xf32> to vector<4x288xbf16>
    %c1_8 = arith.constant 1 : index
    %c0_9 = arith.constant 0 : index
    %c0_10 = arith.constant 0 : index
    %11 = vector.load %arg2[%c1_8, %c0_9, %c0_10] : memref<9x8x4xbf16, #tpu.memory_space<vmem>>, vector<1x8x4xbf16>
    %12 = vector.shape_cast %11 : vector<1x8x4xbf16> to vector<8x4xbf16>
    %cst_11 = arith.constant dense<0.000000e+00> : vector<8x288xf32>
    %13 = tpu.matmul %12, %10, %cst_11 {dimension_numbers = #tpu.dot_dimension_numbers<[1], [0], [0], [1], [0, 0, 1, 1], [], []>} : vector<8x4xbf16>, vector<4x288xbf16>, vector<8x288xf32> -> vector<8x288xf32>
    %14 = arith.addf %7, %13 : vector<8x288xf32>
    %c0_12 = arith.constant 0 : index
    %c0_13 = arith.constant 0 : index
    %c2 = arith.constant 2 : index
    %15 = vector.load %arg1[%c0_12, %c0_13, %c2] : memref<2x4x326xf32, #tpu.memory_space<vmem>>, vector<1x4x288xf32>
    %16 = vector.shape_cast %15 : vector<1x4x288xf32> to vector<4x288xf32>
    %17 = arith.truncf %16 : vector<4x288xf32> to vector<4x288xbf16>
    %c2_14 = arith.constant 2 : index
    %c0_15 = arith.constant 0 : index
    %c0_16 = arith.constant 0 : index
    %18 = vector.load %arg2[%c2_14, %c0_15, %c0_16] : memref<9x8x4xbf16, #tpu.memory_space<vmem>>, vector<1x8x4xbf16>
    %19 = vector.shape_cast %18 : vector<1x8x4xbf16> to vector<8x4xbf16>
    %cst_17 = arith.constant dense<0.000000e+00> : vector<8x288xf32>
    %20 = tpu.matmul %19, %17, %cst_17 {dimension_numbers = #tpu.dot_dimension_numbers<[1], [0], [0], [1], [0, 0, 1, 1], [], []>} : vector<8x4xbf16>, vector<4x288xbf16>, vector<8x288xf32> -> vector<8x288xf32>
    %21 = arith.addf %14, %20 : vector<8x288xf32>
    %c0_18 = arith.constant 0 : index
    %c0_19 = arith.constant 0 : index
    %c18 = arith.constant 18 : index
    %22 = vector.load %arg1[%c0_18, %c0_19, %c18] : memref<2x4x326xf32, #tpu.memory_space<vmem>>, vector<1x4x288xf32>
    %23 = vector.shape_cast %22 : vector<1x4x288xf32> to vector<4x288xf32>
    %24 = arith.truncf %23 : vector<4x288xf32> to vector<4x288xbf16>
    %c3 = arith.constant 3 : index
    %c0_20 = arith.constant 0 : index
    %c0_21 = arith.constant 0 : index
    %25 = vector.load %arg2[%c3, %c0_20, %c0_21] : memref<9x8x4xbf16, #tpu.memory_space<vmem>>, vector<1x8x4xbf16>
    %26 = vector.shape_cast %25 : vector<1x8x4xbf16> to vector<8x4xbf16>
    %cst_22 = arith.constant dense<0.000000e+00> : vector<8x288xf32>
    %27 = tpu.matmul %26, %24, %cst_22 {dimension_numbers = #tpu.dot_dimension_numbers<[1], [0], [0], [1], [0, 0, 1, 1], [], []>} : vector<8x4xbf16>, vector<4x288xbf16>, vector<8x288xf32> -> vector<8x288xf32>
    %28 = arith.addf %21, %27 : vector<8x288xf32>
    %c0_23 = arith.constant 0 : index
    %c0_24 = arith.constant 0 : index
    %c19 = arith.constant 19 : index
    %29 = vector.load %arg1[%c0_23, %c0_24, %c19] : memref<2x4x326xf32, #tpu.memory_space<vmem>>, vector<1x4x288xf32>
    %30 = vector.shape_cast %29 : vector<1x4x288xf32> to vector<4x288xf32>
    %31 = arith.truncf %30 : vector<4x288xf32> to vector<4x288xbf16>
    %c4 = arith.constant 4 : index
    %c0_25 = arith.constant 0 : index
    %c0_26 = arith.constant 0 : index
    %32 = vector.load %arg2[%c4, %c0_25, %c0_26] : memref<9x8x4xbf16, #tpu.memory_space<vmem>>, vector<1x8x4xbf16>
    %33 = vector.shape_cast %32 : vector<1x8x4xbf16> to vector<8x4xbf16>
    %cst_27 = arith.constant dense<0.000000e+00> : vector<8x288xf32>
    %34 = tpu.matmul %33, %31, %cst_27 {dimension_numbers = #tpu.dot_dimension_numbers<[1], [0], [0], [1], [0, 0, 1, 1], [], []>} : vector<8x4xbf16>, vector<4x288xbf16>, vector<8x288xf32> -> vector<8x288xf32>
    %35 = arith.addf %28, %34 : vector<8x288xf32>
    %c0_28 = arith.constant 0 : index
    %c0_29 = arith.constant 0 : index
    %c20 = arith.constant 20 : index
    %36 = vector.load %arg1[%c0_28, %c0_29, %c20] : memref<2x4x326xf32, #tpu.memory_space<vmem>>, vector<1x4x288xf32>
    %37 = vector.shape_cast %36 : vector<1x4x288xf32> to vector<4x288xf32>
    %38 = arith.truncf %37 : vector<4x288xf32> to vector<4x288xbf16>
    %c5 = arith.constant 5 : index
    %c0_30 = arith.constant 0 : index
    %c0_31 = arith.constant 0 : index
    %39 = vector.load %arg2[%c5, %c0_30, %c0_31] : memref<9x8x4xbf16, #tpu.memory_space<vmem>>, vector<1x8x4xbf16>
    %40 = vector.shape_cast %39 : vector<1x8x4xbf16> to vector<8x4xbf16>
    %cst_32 = arith.constant dense<0.000000e+00> : vector<8x288xf32>
    %41 = tpu.matmul %40, %38, %cst_32 {dimension_numbers = #tpu.dot_dimension_numbers<[1], [0], [0], [1], [0, 0, 1, 1], [], []>} : vector<8x4xbf16>, vector<4x288xbf16>, vector<8x288xf32> -> vector<8x288xf32>
    %42 = arith.addf %35, %41 : vector<8x288xf32>
    %c0_33 = arith.constant 0 : index
    %c0_34 = arith.constant 0 : index
    %c36 = arith.constant 36 : index
    %43 = vector.load %arg1[%c0_33, %c0_34, %c36] : memref<2x4x326xf32, #tpu.memory_space<vmem>>, vector<1x4x288xf32>
    %44 = vector.shape_cast %43 : vector<1x4x288xf32> to vector<4x288xf32>
    %45 = arith.truncf %44 : vector<4x288xf32> to vector<4x288xbf16>
    %c6 = arith.constant 6 : index
    %c0_35 = arith.constant 0 : index
    %c0_36 = arith.constant 0 : index
    %46 = vector.load %arg2[%c6, %c0_35, %c0_36] : memref<9x8x4xbf16, #tpu.memory_space<vmem>>, vector<1x8x4xbf16>
    %47 = vector.shape_cast %46 : vector<1x8x4xbf16> to vector<8x4xbf16>
    %cst_37 = arith.constant dense<0.000000e+00> : vector<8x288xf32>
    %48 = tpu.matmul %47, %45, %cst_37 {dimension_numbers = #tpu.dot_dimension_numbers<[1], [0], [0], [1], [0, 0, 1, 1], [], []>} : vector<8x4xbf16>, vector<4x288xbf16>, vector<8x288xf32> -> vector<8x288xf32>
    %49 = arith.addf %42, %48 : vector<8x288xf32>
    %c0_38 = arith.constant 0 : index
    %c0_39 = arith.constant 0 : index
    %c37 = arith.constant 37 : index
    %50 = vector.load %arg1[%c0_38, %c0_39, %c37] : memref<2x4x326xf32, #tpu.memory_space<vmem>>, vector<1x4x288xf32>
    %51 = vector.shape_cast %50 : vector<1x4x288xf32> to vector<4x288xf32>
    %52 = arith.truncf %51 : vector<4x288xf32> to vector<4x288xbf16>
    %c7 = arith.constant 7 : index
    %c0_40 = arith.constant 0 : index
    %c0_41 = arith.constant 0 : index
    %53 = vector.load %arg2[%c7, %c0_40, %c0_41] : memref<9x8x4xbf16, #tpu.memory_space<vmem>>, vector<1x8x4xbf16>
    %54 = vector.shape_cast %53 : vector<1x8x4xbf16> to vector<8x4xbf16>
    %cst_42 = arith.constant dense<0.000000e+00> : vector<8x288xf32>
    %55 = tpu.matmul %54, %52, %cst_42 {dimension_numbers = #tpu.dot_dimension_numbers<[1], [0], [0], [1], [0, 0, 1, 1], [], []>} : vector<8x4xbf16>, vector<4x288xbf16>, vector<8x288xf32> -> vector<8x288xf32>
    %56 = arith.addf %49, %55 : vector<8x288xf32>
    %c0_43 = arith.constant 0 : index
    %c0_44 = arith.constant 0 : index
    %c38 = arith.constant 38 : index
    %57 = vector.load %arg1[%c0_43, %c0_44, %c38] : memref<2x4x326xf32, #tpu.memory_space<vmem>>, vector<1x4x288xf32>
    %58 = vector.shape_cast %57 : vector<1x4x288xf32> to vector<4x288xf32>
    %59 = arith.truncf %58 : vector<4x288xf32> to vector<4x288xbf16>
    %c8 = arith.constant 8 : index
    %c0_45 = arith.constant 0 : index
    %c0_46 = arith.constant 0 : index
    %60 = vector.load %arg2[%c8, %c0_45, %c0_46] : memref<9x8x4xbf16, #tpu.memory_space<vmem>>, vector<1x8x4xbf16>
    %61 = vector.shape_cast %60 : vector<1x8x4xbf16> to vector<8x4xbf16>
    %cst_47 = arith.constant dense<0.000000e+00> : vector<8x288xf32>
    %62 = tpu.matmul %61, %59, %cst_47 {dimension_numbers = #tpu.dot_dimension_numbers<[1], [0], [0], [1], [0, 0, 1, 1], [], []>} : vector<8x4xbf16>, vector<4x288xbf16>, vector<8x288xf32> -> vector<8x288xf32>
    %63 = arith.addf %56, %62 : vector<8x288xf32>
    %c0_48 = arith.constant 0 : index
    %c0_49 = arith.constant 0 : index
    %64 = vector.load %arg3[%c0_48, %c0_49] : memref<8x1xf32, #tpu.memory_space<vmem>>, vector<8x1xf32>
    %65 = vector.broadcast %64 : vector<8x1xf32> to vector<8x288xf32>
    %66 = arith.addf %63, %65 : vector<8x288xf32>
    %cst_50 = arith.constant 0.000000e+00 : f32
    %67 = vector.broadcast %cst_50 : f32 to vector<8x288xf32>
    %68 = arith.maximumf %66, %67 : vector<8x288xf32>
    %c0_51 = arith.constant 0 : index
    %c0_52 = arith.constant 0 : index
    %c0_53 = arith.constant 0 : index
    %69 = vector.load %arg4[%c0_51, %c0_52, %c0_53] : memref<2x8x288xf32, #tpu.memory_space<vmem>>, vector<1x8x288xf32>
    %70 = vector.shape_cast %69 : vector<1x8x288xf32> to vector<8x288xf32>
    %71 = vector.shape_cast %68 : vector<8x288xf32> to vector<1x8x288xf32>
    tpu.vector_store %arg4[%c0_51, %c0_52, %c0_53], %71 {strides = array<i32>} : memref<2x8x288xf32, #tpu.memory_space<vmem>>, vector<1x8x288xf32>,
    %cst_54 = arith.constant 0.000000e+00 : f32
    %72 = vector.broadcast %cst_54 : f32 to vector<8x288xf32>
    %c1_55 = arith.constant 1 : index
    %c0_56 = arith.constant 0 : index
    %c0_57 = arith.constant 0 : index
    %73 = vector.load %arg1[%c1_55, %c0_56, %c0_57] : memref<2x4x326xf32, #tpu.memory_space<vmem>>, vector<1x4x288xf32>
    %74 = vector.shape_cast %73 : vector<1x4x288xf32> to vector<4x288xf32>
    %75 = arith.truncf %74 : vector<4x288xf32> to vector<4x288xbf16>
    %c0_58 = arith.constant 0 : index
    %c0_59 = arith.constant 0 : index
    %c0_60 = arith.constant 0 : index
    %76 = vector.load %arg2[%c0_58, %c0_59, %c0_60] : memref<9x8x4xbf16, #tpu.memory_space<vmem>>, vector<1x8x4xbf16>
    %77 = vector.shape_cast %76 : vector<1x8x4xbf16> to vector<8x4xbf16>
    %cst_61 = arith.constant dense<0.000000e+00> : vector<8x288xf32>
    %78 = tpu.matmul %77, %75, %cst_61 {dimension_numbers = #tpu.dot_dimension_numbers<[1], [0], [0], [1], [0, 0, 1, 1], [], []>} : vector<8x4xbf16>, vector<4x288xbf16>, vector<8x288xf32> -> vector<8x288xf32>
    %79 = arith.addf %72, %78 : vector<8x288xf32>
    %c1_62 = arith.constant 1 : index
    %c0_63 = arith.constant 0 : index
    %c1_64 = arith.constant 1 : index
    %80 = vector.load %arg1[%c1_62, %c0_63, %c1_64] : memref<2x4x326xf32, #tpu.memory_space<vmem>>, vector<1x4x288xf32>
    %81 = vector.shape_cast %80 : vector<1x4x288xf32> to vector<4x288xf32>
    %82 = arith.truncf %81 : vector<4x288xf32> to vector<4x288xbf16>
    %c1_65 = arith.constant 1 : index
    %c0_66 = arith.constant 0 : index
    %c0_67 = arith.constant 0 : index
    %83 = vector.load %arg2[%c1_65, %c0_66, %c0_67] : memref<9x8x4xbf16, #tpu.memory_space<vmem>>, vector<1x8x4xbf16>
    %84 = vector.shape_cast %83 : vector<1x8x4xbf16> to vector<8x4xbf16>
    %cst_68 = arith.constant dense<0.000000e+00> : vector<8x288xf32>
    %85 = tpu.matmul %84, %82, %cst_68 {dimension_numbers = #tpu.dot_dimension_numbers<[1], [0], [0], [1], [0, 0, 1, 1], [], []>} : vector<8x4xbf16>, vector<4x288xbf16>, vector<8x288xf32> -> vector<8x288xf32>
    %86 = arith.addf %79, %85 : vector<8x288xf32>
    %c1_69 = arith.constant 1 : index
    %c0_70 = arith.constant 0 : index
    %c2_71 = arith.constant 2 : index
    %87 = vector.load %arg1[%c1_69, %c0_70, %c2_71] : memref<2x4x326xf32, #tpu.memory_space<vmem>>, vector<1x4x288xf32>
    %88 = vector.shape_cast %87 : vector<1x4x288xf32> to vector<4x288xf32>
    %89 = arith.truncf %88 : vector<4x288xf32> to vector<4x288xbf16>
    %c2_72 = arith.constant 2 : index
    %c0_73 = arith.constant 0 : index
    %c0_74 = arith.constant 0 : index
    %90 = vector.load %arg2[%c2_72, %c0_73, %c0_74] : memref<9x8x4xbf16, #tpu.memory_space<vmem>>, vector<1x8x4xbf16>
    %91 = vector.shape_cast %90 : vector<1x8x4xbf16> to vector<8x4xbf16>
    %cst_75 = arith.constant dense<0.000000e+00> : vector<8x288xf32>
    %92 = tpu.matmul %91, %89, %cst_75 {dimension_numbers = #tpu.dot_dimension_numbers<[1], [0], [0], [1], [0, 0, 1, 1], [], []>} : vector<8x4xbf16>, vector<4x288xbf16>, vector<8x288xf32> -> vector<8x288xf32>
    %93 = arith.addf %86, %92 : vector<8x288xf32>
    %c1_76 = arith.constant 1 : index
    %c0_77 = arith.constant 0 : index
    %c18_78 = arith.constant 18 : index
    %94 = vector.load %arg1[%c1_76, %c0_77, %c18_78] : memref<2x4x326xf32, #tpu.memory_space<vmem>>, vector<1x4x288xf32>
    %95 = vector.shape_cast %94 : vector<1x4x288xf32> to vector<4x288xf32>
    %96 = arith.truncf %95 : vector<4x288xf32> to vector<4x288xbf16>
    %c3_79 = arith.constant 3 : index
    %c0_80 = arith.constant 0 : index
    %c0_81 = arith.constant 0 : index
    %97 = vector.load %arg2[%c3_79, %c0_80, %c0_81] : memref<9x8x4xbf16, #tpu.memory_space<vmem>>, vector<1x8x4xbf16>
    %98 = vector.shape_cast %97 : vector<1x8x4xbf16> to vector<8x4xbf16>
    %cst_82 = arith.constant dense<0.000000e+00> : vector<8x288xf32>
    %99 = tpu.matmul %98, %96, %cst_82 {dimension_numbers = #tpu.dot_dimension_numbers<[1], [0], [0], [1], [0, 0, 1, 1], [], []>} : vector<8x4xbf16>, vector<4x288xbf16>, vector<8x288xf32> -> vector<8x288xf32>
    %100 = arith.addf %93, %99 : vector<8x288xf32>
    %c1_83 = arith.constant 1 : index
    %c0_84 = arith.constant 0 : index
    %c19_85 = arith.constant 19 : index
    %101 = vector.load %arg1[%c1_83, %c0_84, %c19_85] : memref<2x4x326xf32, #tpu.memory_space<vmem>>, vector<1x4x288xf32>
    %102 = vector.shape_cast %101 : vector<1x4x288xf32> to vector<4x288xf32>
    %103 = arith.truncf %102 : vector<4x288xf32> to vector<4x288xbf16>
    %c4_86 = arith.constant 4 : index
    %c0_87 = arith.constant 0 : index
    %c0_88 = arith.constant 0 : index
    %104 = vector.load %arg2[%c4_86, %c0_87, %c0_88] : memref<9x8x4xbf16, #tpu.memory_space<vmem>>, vector<1x8x4xbf16>
    %105 = vector.shape_cast %104 : vector<1x8x4xbf16> to vector<8x4xbf16>
    %cst_89 = arith.constant dense<0.000000e+00> : vector<8x288xf32>
    %106 = tpu.matmul %105, %103, %cst_89 {dimension_numbers = #tpu.dot_dimension_numbers<[1], [0], [0], [1], [0, 0, 1, 1], [], []>} : vector<8x4xbf16>, vector<4x288xbf16>, vector<8x288xf32> -> vector<8x288xf32>
    %107 = arith.addf %100, %106 : vector<8x288xf32>
    %c1_90 = arith.constant 1 : index
    %c0_91 = arith.constant 0 : index
    %c20_92 = arith.constant 20 : index
    %108 = vector.load %arg1[%c1_90, %c0_91, %c20_92] : memref<2x4x326xf32, #tpu.memory_space<vmem>>, vector<1x4x288xf32>
    %109 = vector.shape_cast %108 : vector<1x4x288xf32> to vector<4x288xf32>
    %110 = arith.truncf %109 : vector<4x288xf32> to vector<4x288xbf16>
    %c5_93 = arith.constant 5 : index
    %c0_94 = arith.constant 0 : index
    %c0_95 = arith.constant 0 : index
    %111 = vector.load %arg2[%c5_93, %c0_94, %c0_95] : memref<9x8x4xbf16, #tpu.memory_space<vmem>>, vector<1x8x4xbf16>
    %112 = vector.shape_cast %111 : vector<1x8x4xbf16> to vector<8x4xbf16>
    %cst_96 = arith.constant dense<0.000000e+00> : vector<8x288xf32>
    %113 = tpu.matmul %112, %110, %cst_96 {dimension_numbers = #tpu.dot_dimension_numbers<[1], [0], [0], [1], [0, 0, 1, 1], [], []>} : vector<8x4xbf16>, vector<4x288xbf16>, vector<8x288xf32> -> vector<8x288xf32>
    %114 = arith.addf %107, %113 : vector<8x288xf32>
    %c1_97 = arith.constant 1 : index
    %c0_98 = arith.constant 0 : index
    %c36_99 = arith.constant 36 : index
    %115 = vector.load %arg1[%c1_97, %c0_98, %c36_99] : memref<2x4x326xf32, #tpu.memory_space<vmem>>, vector<1x4x288xf32>
    %116 = vector.shape_cast %115 : vector<1x4x288xf32> to vector<4x288xf32>
    %117 = arith.truncf %116 : vector<4x288xf32> to vector<4x288xbf16>
    %c6_100 = arith.constant 6 : index
    %c0_101 = arith.constant 0 : index
    %c0_102 = arith.constant 0 : index
    %118 = vector.load %arg2[%c6_100, %c0_101, %c0_102] : memref<9x8x4xbf16, #tpu.memory_space<vmem>>, vector<1x8x4xbf16>
    %119 = vector.shape_cast %118 : vector<1x8x4xbf16> to vector<8x4xbf16>
    %cst_103 = arith.constant dense<0.000000e+00> : vector<8x288xf32>
    %120 = tpu.matmul %119, %117, %cst_103 {dimension_numbers = #tpu.dot_dimension_numbers<[1], [0], [0], [1], [0, 0, 1, 1], [], []>} : vector<8x4xbf16>, vector<4x288xbf16>, vector<8x288xf32> -> vector<8x288xf32>
    %121 = arith.addf %114, %120 : vector<8x288xf32>
    %c1_104 = arith.constant 1 : index
    %c0_105 = arith.constant 0 : index
    %c37_106 = arith.constant 37 : index
    %122 = vector.load %arg1[%c1_104, %c0_105, %c37_106] : memref<2x4x326xf32, #tpu.memory_space<vmem>>, vector<1x4x288xf32>
    %123 = vector.shape_cast %122 : vector<1x4x288xf32> to vector<4x288xf32>
    %124 = arith.truncf %123 : vector<4x288xf32> to vector<4x288xbf16>
    %c7_107 = arith.constant 7 : index
    %c0_108 = arith.constant 0 : index
    %c0_109 = arith.constant 0 : index
    %125 = vector.load %arg2[%c7_107, %c0_108, %c0_109] : memref<9x8x4xbf16, #tpu.memory_space<vmem>>, vector<1x8x4xbf16>
    %126 = vector.shape_cast %125 : vector<1x8x4xbf16> to vector<8x4xbf16>
    %cst_110 = arith.constant dense<0.000000e+00> : vector<8x288xf32>
    %127 = tpu.matmul %126, %124, %cst_110 {dimension_numbers = #tpu.dot_dimension_numbers<[1], [0], [0], [1], [0, 0, 1, 1], [], []>} : vector<8x4xbf16>, vector<4x288xbf16>, vector<8x288xf32> -> vector<8x288xf32>
    %128 = arith.addf %121, %127 : vector<8x288xf32>
    %c1_111 = arith.constant 1 : index
    %c0_112 = arith.constant 0 : index
    %c38_113 = arith.constant 38 : index
    %129 = vector.load %arg1[%c1_111, %c0_112, %c38_113] : memref<2x4x326xf32, #tpu.memory_space<vmem>>, vector<1x4x288xf32>
    %130 = vector.shape_cast %129 : vector<1x4x288xf32> to vector<4x288xf32>
    %131 = arith.truncf %130 : vector<4x288xf32> to vector<4x288xbf16>
    %c8_114 = arith.constant 8 : index
    %c0_115 = arith.constant 0 : index
    %c0_116 = arith.constant 0 : index
    %132 = vector.load %arg2[%c8_114, %c0_115, %c0_116] : memref<9x8x4xbf16, #tpu.memory_space<vmem>>, vector<1x8x4xbf16>
    %133 = vector.shape_cast %132 : vector<1x8x4xbf16> to vector<8x4xbf16>
    %cst_117 = arith.constant dense<0.000000e+00> : vector<8x288xf32>
    %134 = tpu.matmul %133, %131, %cst_117 {dimension_numbers = #tpu.dot_dimension_numbers<[1], [0], [0], [1], [0, 0, 1, 1], [], []>} : vector<8x4xbf16>, vector<4x288xbf16>, vector<8x288xf32> -> vector<8x288xf32>
    %135 = arith.addf %128, %134 : vector<8x288xf32>
    %c0_118 = arith.constant 0 : index
    %c0_119 = arith.constant 0 : index
    %136 = vector.load %arg3[%c0_118, %c0_119] : memref<8x1xf32, #tpu.memory_space<vmem>>, vector<8x1xf32>
    %137 = vector.broadcast %136 : vector<8x1xf32> to vector<8x288xf32>
    %138 = arith.addf %135, %137 : vector<8x288xf32>
    %cst_120 = arith.constant 0.000000e+00 : f32
    %139 = vector.broadcast %cst_120 : f32 to vector<8x288xf32>
    %140 = arith.maximumf %138, %139 : vector<8x288xf32>
    %c1_121 = arith.constant 1 : index
    %c0_122 = arith.constant 0 : index
    %c0_123 = arith.constant 0 : index
    %141 = vector.load %arg4[%c1_121, %c0_122, %c0_123] : memref<2x8x288xf32, #tpu.memory_space<vmem>>, vector<1x8x288xf32>
    %142 = vector.shape_cast %141 : vector<1x8x288xf32> to vector<8x288xf32>
    %143 = vector.shape_cast %140 : vector<8x288xf32> to vector<1x8x288xf32>
    tpu.vector_store %arg4[%c1_121, %c0_122, %c0_123], %143 {strides = array<i32>} : memref<2x8x288xf32, #tpu.memory_space<vmem>>, vector<1x8x288xf32>,
    return
  }
  func.func @transform_0(%arg0: i32) -> (i32, i32, i32) {
    %c0_i32 = arith.constant 0 : i32
    %c0_i32_0 = arith.constant 0 : i32
    %c0_i32_1 = arith.constant 0 : i32
    return %arg0, %c0_i32, %c0_i32_0 : i32, i32, i32
  }
  func.func @transform_1(%arg0: i32) -> (i32, i32, i32) {
    %c0_i32 = arith.constant 0 : i32
    %c0_i32_0 = arith.constant 0 : i32
    %c0_i32_1 = arith.constant 0 : i32
    %c0_i32_2 = arith.constant 0 : i32
    return %c0_i32, %c0_i32_0, %c0_i32_1 : i32, i32, i32
  }
  func.func @transform_2(%arg0: i32) -> (i32, i32) {
    %c0_i32 = arith.constant 0 : i32
    %c0_i32_0 = arith.constant 0 : i32
    %c0_i32_1 = arith.constant 0 : i32
    return %c0_i32, %c0_i32_0 : i32, i32
  }
  func.func @transform_3(%arg0: i32) -> (i32, i32, i32) {
    %c0_i32 = arith.constant 0 : i32
    %c0_i32_0 = arith.constant 0 : i32
    %c0_i32_1 = arith.constant 0 : i32
    return %arg0, %c0_i32, %c0_i32_0 : i32, i32, i32
  }
}

</mosaic_0001>

<bundles_post_ra>
// kernel: tpu_custom_call.1
= control target key start
LH: loop header
LB: loop body
LE: loop exit
PB: predicated region body
PF: predicated region fallthrough
CT: control target
= control target key end

     0   :  { %s2391_s16 = smov 127   ;;  %s2392_s19 = smov 126   ;;  %v2393_v8 = vmov 0.0   ;;  %vm2394_vm0 = vmmov 0   ;;  %v2395_v9 = vmov 0   ;;  %s2837_s0 = inlined_call_operand.vmem [shape: f32[2,4,326], index: 0, kind: input, shape index: {}]   ;;  %s2838_s1 = inlined_call_operand.vmem [shape: bf16[9,8,4], index: 1, kind: input, shape index: {}]   ;;  %s2839_s2 = inlined_call_operand.vmem [shape: f32[8,1], index: 2, kind: input, shape index: {}]   ;;  %s2840_s3 = inlined_call_operand.hbm [shape: f32[2,8,288], index: 3, kind: output, shape index: {}]  }
   0x1   :  { %v17_v0 = vld [vmem:[%s2837_s0 + $0x8] sm:$0xf]  ;;  %v16_v1 = vld [vmem:[%s2837_s0] sm:$0xff]  ;;  %2243 = vmatprep.subr.bf16.mxu1 %v2393_v8  ;;  %2245 = vmatprep.mubr.msk.bf16.mxu1 %vm2394_vm0, %v2393_v8 }
   0x2   :  { %v2431_v2 = vpack.c.bf16 %v17_v0, %v17_v0  ;;  %v2433_v3 = vpack.c.bf16 %v16_v1, %v16_v1  ;;  %v19_v4 = vcombine.high %v16_v1, %v16_v1  ;;  %v228_v6 = vld [vmem:[%s2837_s0 + $0x8] sm:$0xf]  ;;  %85 = vmatprep.mubr.bf16.mxu0 %v2395_v9  ;;  %2365 = vset.pattern.permute.xlu0 %v2395_v9 }
   0x3   :  { %v234_v7 = vpack.c.bf16 %v228_v6, %v228_v6  ;;  %2366 = vset.pattern.permute.xlu1 %v2395_v9 }
   0x4   :  { %34 = vrot.lane.b32.xlu1 %v2431_v2, %s2391_s16  ;;  %30 = vrot.lane.b32.xlu0 %v2433_v3, %s2391_s16  ;;  %v2439_v5 = vpack.c.bf16 %v19_v4, %v19_v4 }
   0x8   :  { %32 = vrot.lane.b32.xlu0 %v2439_v5, %s2391_s16  ;;  %240 = vrot.lane.b32.xlu1 %v2433_v3, %s2392_s19 }
   0x9   :  { %8 = vsyncpa [#allocation3], 0  ;;  %v346_v10 = vld [vmem:[%s2837_s0 + $0x8] sm:$0xf]  ;;  %s2396_s22 = smov 110   ;;  %s2397_s25 = smov 109  }
   0xa   :  { %v352_v11 = vpack.c.bf16 %v346_v10, %v346_v10  ;;  %v464_v12 = vld [vmem:[%s2837_s0 + $0x8] sm:$0xf]  ;;  %s2398_s28 = smov 108   ;;  %s2399_s4 = smov 92   ;;  %v2156_v21 = vld [vmem:[%s2837_s0 + $0xc] sm:$0xff]  ;;  %vm43_vm1 = vcmask 1041408  }
   0xb   :  { %v470_v13 = vpack.c.bf16 %v464_v12, %v464_v12  ;;  %v582_v14 = vld [vmem:[%s2837_s0 + $0x8] sm:$0xf]  ;;  %s2400_s7 = smov 91   ;;  %s2401_s12 = smov 90   ;;  %v1073_v23 = vcombine.high %v2156_v21, %v2156_v21  ;;  %v2508_v24 = vpack.c.bf16 %v2156_v21, %v2156_v21  ;;  %v2157_v26 = vld [vmem:[%s2837_s0 + $0x14] sm:$0xf] }
   0xc   :  { %242 = vrot.lane.b32.xlu0 %v2439_v5, %s2392_s19  ;;  %244 = vrot.lane.b32.xlu1 %v234_v7, %s2392_s19  ;;  %v588_v15 = vpack.c.bf16 %v582_v14, %v582_v14  ;;  %v700_v16 = vld [vmem:[%s2837_s0 + $0x8] sm:$0xf]  ;;  %v2519_v27 = vpack.c.bf16 %v2157_v26, %v2157_v26  ;;  %v2166_v28 = vld [vmem:[%s2837_s0 + $0x14] sm:$0xf]  ;;  %vm39_vm2 = vcmask 31744   ;;  %vm36_vm3 = vcmask 1039360  }
   0xd   :  { %v706_v17 = vpack.c.bf16 %v700_v16, %v700_v16  ;;  %v818_v18 = vld [vmem:[%s2837_s0 + $0x8] sm:$0xf]  ;;  %v2510_v25 = vpack.c.bf16 %v1073_v23, %v1073_v23  ;;  %v1284_v29 = vpack.c.bf16 %v2166_v28, %v2166_v28  ;;  %v2172_v30 = vld [vmem:[%s2837_s0 + $0x14] sm:$0xf]  ;;  %v2121_v45 = vld [vmem:[%s2838_s1 + $0x4] sm:$0xf] }
   0xe   :  { %v824_v19 = vpack.c.bf16 %v818_v18, %v818_v18  ;;  %v936_v20 = vld [vmem:[%s2837_s0 + $0x8] sm:$0xf]  ;;  %v1400_v31 = vpack.c.bf16 %v2172_v30, %v2172_v30  ;;  %v2178_v32 = vld [vmem:[%s2837_s0 + $0x14] sm:$0xf]  ;;  %v144_v46 = vsel %vm43_vm1, %v2431_v2, 0  ;;  %vm246_vm4 = vcmask 1031168  }
   0xf   :  { %v942_v22 = vpack.c.bf16 %v936_v20, %v936_v20  ;;  %v1516_v33 = vpack.c.bf16 %v2178_v32, %v2178_v32  ;;  %v2184_v34 = vld [vmem:[%s2837_s0 + $0x14] sm:$0xf]  ;;  %v138_v52 = vsel %vm43_vm1, %v2433_v3, 0  ;;  %v24_v56 = vld [vmem:[%s2838_s1] sm:$0xf]  ;;  %vm364_vm5 = vcmask 900096  }
  0x10   :  { %358 = vrot.lane.b32.xlu0 %v2433_v3, %s2396_s22  ;;  %360 = vrot.lane.b32.xlu1 %v2439_v5, %s2396_s22  ;;  %v1632_v35 = vpack.c.bf16 %v2184_v34, %v2184_v34  ;;  %v2190_v36 = vld [vmem:[%s2837_s0 + $0x14] sm:$0xf]  ;;  %v1053_v58 = vld [vmem:[%s2839_s2] sm:$0xff]  ;;  %vm482_vm6 = vcmask 891904   ;;  %vm600_vm7 = vcmask 883712   ;;  %vm718_vm8 = vcmask 752640  }
  0x11   :  { %v1748_v37 = vpack.c.bf16 %v2190_v36, %v2190_v36  ;;  %v2196_v38 = vld [vmem:[%s2837_s0 + $0x14] sm:$0xf]  ;;  %v2128_v2 = vld [vmem:[%s2838_s1 + $0x8] sm:$0xf]  ;;  %v2132_v12 = vld [vmem:[%s2838_s1 + $0xc] sm:$0xf] }
  0x12   :  { %v1864_v39 = vpack.c.bf16 %v2196_v38, %v2196_v38  ;;  %v2202_v40 = vld [vmem:[%s2837_s0 + $0x14] sm:$0xf]  ;;  %v2136_v20 = vld [vmem:[%s2838_s1 + $0x10] sm:$0xf]  ;;  %vm836_vm9 = vcmask 744448   ;;  %vm954_vm10 = vcmask 736256  }
  0x13   :  { %v1980_v41 = vpack.c.bf16 %v2202_v40, %v2202_v40  ;;  %vm1067_vm11 = vcmask 261120  }
  0x14   :  { %362 = vrot.lane.b32.xlu0 %v352_v11, %s2396_s22  ;;  %476 = vrot.lane.b32.xlu1 %v2433_v3, %s2397_s25 }
  0x18   :  { %478 = vrot.lane.b32.xlu0 %v2439_v5, %s2397_s25  ;;  %480 = vrot.lane.b32.xlu1 %v470_v13, %s2397_s25 }
  0x1c   :  { %594 = vrot.lane.b32.xlu0 %v2433_v3, %s2398_s28  ;;  %596 = vrot.lane.b32.xlu1 %v2439_v5, %s2398_s28 }
  0x20   :  { %598 = vrot.lane.b32.xlu0 %v588_v15, %s2398_s28  ;;  %712 = vrot.lane.b32.xlu1 %v2433_v3, %s2399_s4 }
  0x24   :  { %714 = vrot.lane.b32.xlu0 %v2439_v5, %s2399_s4  ;;  %716 = vrot.lane.b32.xlu1 %v706_v17, %s2399_s4 }
  0x28   :  { %830 = vrot.lane.b32.xlu0 %v2433_v3, %s2400_s7  ;;  %832 = vrot.lane.b32.xlu1 %v2439_v5, %s2400_s7 }
  0x2c   :  { %834 = vrot.lane.b32.xlu0 %v824_v19, %s2400_s7  ;;  %948 = vrot.lane.b32.xlu1 %v2433_v3, %s2401_s12 }
  0x30   :  { %950 = vrot.lane.b32.xlu0 %v2439_v5, %s2401_s12  ;;  %952 = vrot.lane.b32.xlu1 %v942_v22, %s2401_s12 }
  0x34   :  { %1083 = vrot.lane.b32.xlu0 %v2508_v24, %s2391_s16  ;;  %1085 = vrot.lane.b32.xlu1 %v2510_v25, %s2391_s16 }
  0x38   :  { %1087 = vrot.lane.b32.xlu0 %v2519_v27, %s2391_s16  ;;  %1289 = vrot.lane.b32.xlu1 %v2508_v24, %s2392_s19 }
  0x3c   :  { %1291 = vrot.lane.b32.xlu0 %v2510_v25, %s2392_s19  ;;  %1293 = vrot.lane.b32.xlu1 %v1284_v29, %s2392_s19 }
  0x40   :  { %1405 = vrot.lane.b32.xlu0 %v2508_v24, %s2396_s22  ;;  %1407 = vrot.lane.b32.xlu1 %v2510_v25, %s2396_s22 }
  0x44   :  { %1409 = vrot.lane.b32.xlu0 %v1400_v31, %s2396_s22  ;;  %1521 = vrot.lane.b32.xlu1 %v2508_v24, %s2397_s25  ;;  %v2140_v31 = vld [vmem:[%s2838_s1 + $0x14] sm:$0xf] }
  0x48   :  { %1523 = vrot.lane.b32.xlu0 %v2510_v25, %s2397_s25  ;;  %1525 = vrot.lane.b32.xlu1 %v1516_v33, %s2397_s25 }
  0x4c   :  { %1637 = vrot.lane.b32.xlu0 %v2508_v24, %s2398_s28  ;;  %1639 = vrot.lane.b32.xlu1 %v2510_v25, %s2398_s28 }
  0x50   :  { %1641 = vrot.lane.b32.xlu0 %v1632_v35, %s2398_s28  ;;  %1753 = vrot.lane.b32.xlu1 %v2508_v24, %s2399_s4 }
  0x54   :  { %1755 = vrot.lane.b32.xlu0 %v2510_v25, %s2399_s4  ;;  %1757 = vrot.lane.b32.xlu1 %v1748_v37, %s2399_s4 }
  0x58   :  { %1869 = vrot.lane.b32.xlu0 %v2508_v24, %s2400_s7  ;;  %1871 = vrot.lane.b32.xlu1 %v2510_v25, %s2400_s7 }
  0x5c   :  { %1873 = vrot.lane.b32.xlu0 %v1864_v39, %s2400_s7  ;;  %1985 = vrot.lane.b32.xlu1 %v2508_v24, %s2401_s12  ;;  %v2144_v39 = vld [vmem:[%s2838_s1 + $0x18] sm:$0xf] }
  0x60   :  { %1987 = vrot.lane.b32.xlu0 %v2510_v25, %s2401_s12  ;;  %1989 = vrot.lane.b32.xlu1 %v1980_v41, %s2401_s12 }
  0x64   :  { %1056 = vperm.xlu0 %2365, %v1053_v58   ;;  %2092 = vperm.xlu1 %2366, %v1053_v58  }
  0x76   :  { %v35_v42 = vpop.permute.xlu1 %34  ;;  %v31_v43 = vpop.permute.xlu0 %30 }
  0x77   :  { %v51_v44 = vsel %vm43_vm1, %v35_v42, 0 }
  0x78   :  { %2244 = vmatpush3.bf16.msra.mxu1 %v51_v44 }
  0x79   :  { %2249 = vmatprep.subr.bf16.mxu1 %v2393_v8 }
  0x7a   :  { %v33_v47 = vpop.permute.xlu0 %32  ;;  %v241_v48 = vpop.permute.xlu1 %240 }
  0x7b   :  { %2246 = vmatmul.mubr.msk.bf16.vlgmr.msra.gmra.mxu1 %vm39_vm2, %v2121_v45  ;;  %v38_v49 = vsel %vm36_vm3, %v33_v47, %v35_v42  ;;  %v37_v50 = vsel %vm36_vm3, %v31_v43, %v33_v47  ;;  %v2148_v47 = vld [vmem:[%s2838_s1 + $0x1c] sm:$0xf] }
  0x7c   :  { %2122 = vmatprep.subr.msk.bf16.mxu0 %vm43_vm1, %v38_v49  ;;  %v45_v51 = vsel %vm43_vm1, %v37_v50, 0  ;;  %2250 = vmatpush3.bf16.msra.mxu1 %v144_v46 }
  0x7d   :  { %68 = vmatpush1.bf16.msra.mxu0 %v45_v51  ;;  %2251 = vmatprep.mubr.msk.bf16.mxu1 %vm2394_vm0, %v2393_v8 }
  0x7e   :  { %2125 = vmatprep.subr.msk.bf16.mxu0 %vm43_vm1, %v2439_v5  ;;  %v243_v53 = vpop.permute.xlu0 %242  ;;  %v245_v54 = vpop.permute.xlu1 %244  ;;  %2255 = vmatprep.subr.bf16.mxu1 %v2393_v8 }
  0x7f   :  { %v248_v55 = vsel %vm246_vm4, %v243_v53, %v245_v54  ;;  %v259_v57 = vsel %vm43_vm1, %v245_v54, 0  ;;  %v247_v61 = vsel %vm246_vm4, %v241_v48, %v243_v53  ;;  %v2152_v54 = vld [vmem:[%s2838_s1 + $0x20] sm:$0xf] }
  0x80   :  { %2123 = vmatmul.mubr.msk.bf16.vlgmr.msra.gmra.mxu0 %vm39_vm2, %v2121_v45  ;;  %v253_v62 = vsel %vm43_vm1, %v247_v61, 0  ;;  %v1194_v61 = vsel %vm43_vm1, %v2519_v27, 0 }
  0x81   :  { %161 = vmatpush1.bf16.msra.mxu0 %v138_v52  ;;  %178 = vmatprep.mubr.bf16.mxu0 %v2395_v9 }
  0x82   :  { %2129 = vmatprep.subr.msk.bf16.mxu0 %vm43_vm1, %v248_v55  ;;  %v359_v59 = vpop.permute.xlu0 %358  ;;  %v361_v60 = vpop.permute.xlu1 %360 }
  0x83   :  { %2252 = vmatmul.mubr.msk.bf16.vlgmr.msra.gmra.mxu1 %vm39_vm2, %v24_v56  ;;  %v365_v5 = vsel %vm364_vm5, %v359_v59, %v361_v60  ;;  %v2158_v59 = vld [vmem:[%s2838_s1 + $0x4] sm:$0xf] }
  0x84   :  { %2256 = vmatpush3.bf16.msra.mxu1 %v259_v57  ;;  %2257 = vmatprep.mubr.msk.bf16.mxu1 %vm2394_vm0, %v2393_v8  ;;  %v371_v7 = vsel %vm43_vm1, %v365_v5, 0 }
  0x85   :  { %2261 = vmatprep.subr.bf16.mxu1 %v2393_v8 }
  0x86   :  { %v363_v63 = vpop.permute.xlu0 %362  ;;  %v477_v0 = vpop.permute.xlu1 %476 }
  0x87   :  { %v366_v1 = vsel %vm364_vm5, %v361_v60, %v363_v63  ;;  %v377_v3 = vsel %vm43_vm1, %v363_v63, 0  ;;  %v1188_v63 = vsel %vm43_vm1, %v2508_v24, 0 }
  0x88   :  { %2126 = vmatmul.mubr.msk.bf16.vlgmr.msra.gmra.mxu0 %vm39_vm2, %v24_v56 }
  0x89   :  { %276 = vmatpush1.bf16.msra.mxu0 %v253_v62  ;;  %293 = vmatprep.mubr.bf16.mxu0 %v2395_v9 }
  0x8a   :  { %2133 = vmatprep.subr.msk.bf16.mxu0 %vm43_vm1, %v366_v1  ;;  %v479_v4 = vpop.permute.xlu0 %478  ;;  %v481_v6 = vpop.permute.xlu1 %480 }
  0x8b   :  { %2258 = vmatmul.mubr.msk.bf16.vlgmr.msra.gmra.mxu1 %vm39_vm2, %v2128_v2  ;;  %v484_v11 = vsel %vm482_vm6, %v479_v4, %v481_v6  ;;  %v495_v14 = vsel %vm43_vm1, %v481_v6, 0  ;;  %v483_v15 = vsel %vm482_vm6, %v477_v0, %v479_v4 }
  0x8c   :  { %2262 = vmatpush3.bf16.msra.mxu1 %v377_v3  ;;  %2263 = vmatprep.mubr.msk.bf16.mxu1 %vm2394_vm0, %v2393_v8  ;;  %v489_v17 = vsel %vm43_vm1, %v483_v15, 0 }
  0x8d   :  { %2267 = vmatprep.subr.bf16.mxu1 %v2393_v8 }
  0x8e   :  { %v595_v10 = vpop.permute.xlu0 %594  ;;  %v597_v13 = vpop.permute.xlu1 %596 }
  0x8f   :  { %v601_v23 = vsel %vm600_vm7, %v595_v10, %v597_v13 }
  0x90   :  { %2130 = vmatmul.mubr.msk.bf16.vlgmr.msra.gmra.mxu0 %vm39_vm2, %v2128_v2  ;;  %v607_v28 = vsel %vm43_vm1, %v601_v23, 0 }
  0x91   :  { %394 = vmatpush1.bf16.msra.mxu0 %v371_v7  ;;  %411 = vmatprep.mubr.bf16.mxu0 %v2395_v9  ;;  %v2167_v7 = vld [vmem:[%s2838_s1 + $0x8] sm:$0xf] }
  0x92   :  { %2137 = vmatprep.subr.msk.bf16.mxu0 %vm43_vm1, %v484_v11  ;;  %v599_v16 = vpop.permute.xlu0 %598  ;;  %v713_v18 = vpop.permute.xlu1 %712 }
  0x93   :  { %2264 = vmatmul.mubr.msk.bf16.vlgmr.msra.gmra.mxu1 %vm39_vm2, %v2132_v12  ;;  %v602_v19 = vsel %vm600_vm7, %v597_v13, %v599_v16  ;;  %v613_v22 = vsel %vm43_vm1, %v599_v16, 0 }
  0x94   :  { %2268 = vmatpush3.bf16.msra.mxu1 %v495_v14  ;;  %2269 = vmatprep.mubr.msk.bf16.mxu1 %vm2394_vm0, %v2393_v8 }
  0x95   :  { %2273 = vmatprep.subr.bf16.mxu1 %v2393_v8 }
  0x96   :  { %v715_v21 = vpop.permute.xlu0 %714  ;;  %v717_v26 = vpop.permute.xlu1 %716 }
  0x97   :  { %v720_v30 = vsel %vm718_vm8, %v715_v21, %v717_v26  ;;  %v731_v33 = vsel %vm43_vm1, %v717_v26, 0  ;;  %v719_v34 = vsel %vm718_vm8, %v713_v18, %v715_v21 }
  0x98   :  { %2134 = vmatmul.mubr.msk.bf16.vlgmr.msra.gmra.mxu0 %vm39_vm2, %v2132_v12  ;;  %v725_v36 = vsel %vm43_vm1, %v719_v34, 0 }
  0x99   :  { %512 = vmatpush1.bf16.msra.mxu0 %v489_v17  ;;  %529 = vmatprep.mubr.bf16.mxu0 %v2395_v9  ;;  %v2173_v17 = vld [vmem:[%s2838_s1 + $0xc] sm:$0xf] }
  0x9a   :  { %2141 = vmatprep.subr.msk.bf16.mxu0 %vm43_vm1, %v602_v19  ;;  %v831_v29 = vpop.permute.xlu0 %830  ;;  %v833_v32 = vpop.permute.xlu1 %832 }
  0x9b   :  { %2270 = vmatmul.mubr.msk.bf16.vlgmr.msra.gmra.mxu1 %vm39_vm2, %v2136_v20  ;;  %v837_v42 = vsel %vm836_vm9, %v831_v29, %v833_v32 }
  0x9c   :  { %2274 = vmatpush3.bf16.msra.mxu1 %v613_v22  ;;  %2275 = vmatprep.mubr.msk.bf16.mxu1 %vm2394_vm0, %v2393_v8  ;;  %v843_v44 = vsel %vm43_vm1, %v837_v42, 0 }
  0x9d   :  { %2279 = vmatprep.subr.bf16.mxu1 %v2393_v8 }
  0x9e   :  { %v835_v35 = vpop.permute.xlu0 %834  ;;  %v949_v37 = vpop.permute.xlu1 %948 }
  0x9f   :  { %v838_v38 = vsel %vm836_vm9, %v833_v32, %v835_v35  ;;  %v849_v41 = vsel %vm43_vm1, %v835_v35, 0 }
  0xa0   :  { %2138 = vmatmul.mubr.msk.bf16.vlgmr.msra.gmra.mxu0 %vm39_vm2, %v2136_v20 }
  0xa1   :  { %630 = vmatpush1.bf16.msra.mxu0 %v607_v28  ;;  %647 = vmatprep.mubr.bf16.mxu0 %v2395_v9  ;;  %v2179_v28 = vld [vmem:[%s2838_s1 + $0x10] sm:$0xf] }
  0xa2   :  { %2145 = vmatprep.subr.msk.bf16.mxu0 %vm43_vm1, %v720_v30  ;;  %v951_v40 = vpop.permute.xlu0 %950  ;;  %v953_v43 = vpop.permute.xlu1 %952 }
  0xa3   :  { %2276 = vmatmul.mubr.msk.bf16.vlgmr.msra.gmra.mxu1 %vm39_vm2, %v2140_v31  ;;  %v956_v46 = vsel %vm954_vm10, %v951_v40, %v953_v43  ;;  %v967_v48 = vsel %vm43_vm1, %v953_v43, 0  ;;  %v955_v49 = vsel %vm954_vm10, %v949_v37, %v951_v40 }
  0xa4   :  { %2280 = vmatpush3.bf16.msra.mxu1 %v731_v33  ;;  %2281 = vmatprep.mubr.msk.bf16.mxu1 %vm2394_vm0, %v2393_v8  ;;  %v961_v52 = vsel %vm43_vm1, %v955_v49, 0 }
  0xa5   :  { %2285 = vmatprep.subr.bf16.mxu1 %v2393_v8 }
  0xa6   :  { %v1084_v45 = vpop.permute.xlu0 %1083  ;;  %v1086_v50 = vpop.permute.xlu1 %1085 }
  0xa7   :  { %v1089_v56 = vsel %vm36_vm3, %v1084_v45, %v1086_v50 }
  0xa8   :  { %2142 = vmatmul.mubr.msk.bf16.vlgmr.msra.gmra.mxu0 %vm39_vm2, %v2140_v31  ;;  %v1095_v57 = vsel %vm43_vm1, %v1089_v56, 0 }
  0xa9   :  { %748 = vmatpush1.bf16.msra.mxu0 %v725_v36  ;;  %765 = vmatprep.mubr.bf16.mxu0 %v2395_v9  ;;  %v2185_v36 = vld [vmem:[%s2838_s1 + $0x14] sm:$0xf] }
  0xaa   :  { %2149 = vmatprep.subr.msk.bf16.mxu0 %vm43_vm1, %v838_v38  ;;  %v1088_v51 = vpop.permute.xlu0 %1087  ;;  %v1290_v58 = vpop.permute.xlu1 %1289 }
  0xab   :  { %2282 = vmatmul.mubr.msk.bf16.vlgmr.msra.gmra.mxu1 %vm39_vm2, %v2144_v39  ;;  %v1090_v53 = vsel %vm36_vm3, %v1086_v50, %v1088_v51  ;;  %v1101_v55 = vsel %vm43_vm1, %v1088_v51, 0  ;;  %v2197_v51 = vld [vmem:[%s2838_s1 + $0x1c] sm:$0xf] }
  0xac   :  { %2286 = vmatpush3.bf16.msra.mxu1 %v849_v41  ;;  %2287 = vmatprep.mubr.msk.bf16.mxu1 %vm2394_vm0, %v2393_v8 }
  0xad   :  { %2291 = vmatprep.subr.bf16.mxu1 %v2393_v8 }
  0xae   :  { %v1292_v60 = vpop.permute.xlu0 %1291  ;;  %v1294_v62 = vpop.permute.xlu1 %1293 }
  0xaf   :  { %v1296_v1 = vsel %vm246_vm4, %v1292_v60, %v1294_v62  ;;  %v1307_v2 = vsel %vm43_vm1, %v1294_v62, 0  ;;  %v1295_v3 = vsel %vm246_vm4, %v1290_v58, %v1292_v60 }
  0xb0   :  { %2146 = vmatmul.mubr.msk.bf16.vlgmr.msra.gmra.mxu0 %vm39_vm2, %v2144_v39  ;;  %v1301_v4 = vsel %vm43_vm1, %v1295_v3, 0 }
  0xb1   :  { %866 = vmatpush1.bf16.msra.mxu0 %v843_v44  ;;  %883 = vmatprep.mubr.bf16.mxu0 %v2395_v9  ;;  %v2191_v44 = vld [vmem:[%s2838_s1 + $0x18] sm:$0xf] }
  0xb2   :  { %2153 = vmatprep.subr.msk.bf16.mxu0 %vm43_vm1, %v956_v46  ;;  %v1406_v0 = vpop.permute.xlu0 %1405  ;;  %v1408_v27 = vpop.permute.xlu1 %1407 }
  0xb3   :  { %2288 = vmatmul.mubr.msk.bf16.vlgmr.msra.gmra.mxu1 %vm39_vm2, %v2148_v47  ;;  %v1411_v12 = vsel %vm364_vm5, %v1406_v0, %v1408_v27 }
  0xb4   :  { %2292 = vmatpush3.bf16.msra.mxu1 %v967_v48  ;;  %2293 = vmatprep.mubr.msk.bf16.mxu1 %vm2394_vm0, %v2393_v8  ;;  %v1417_v14 = vsel %vm43_vm1, %v1411_v12, 0 }
  0xb5   :  { %2297 = vmatprep.subr.bf16.mxu1 %v2393_v8 }
  0xb6   :  { %v1410_v24 = vpop.permute.xlu0 %1409  ;;  %v1522_v5 = vpop.permute.xlu1 %1521 }
  0xb7   :  { %v1412_v6 = vsel %vm364_vm5, %v1408_v27, %v1410_v24  ;;  %v1423_v11 = vsel %vm43_vm1, %v1410_v24, 0 }
  0xb8   :  { %2150 = vmatmul.mubr.msk.bf16.vlgmr.msra.gmra.mxu0 %vm39_vm2, %v2148_v47 }
  0xb9   :  { %984 = vmatpush1.bf16.msra.mxu0 %v961_v52  ;;  %1001 = vmatprep.mubr.bf16.mxu0 %v2395_v9 }
  0xba   :  { %2159 = vmatprep.subr.msk.bf16.mxu0 %vm43_vm1, %v1090_v53  ;;  %v1524_v10 = vpop.permute.xlu0 %1523  ;;  %v1526_v13 = vpop.permute.xlu1 %1525 }
  0xbb   :  { %2294 = vmatmul.mubr.msk.bf16.vlgmr.msra.gmra.mxu1 %vm39_vm2, %v2152_v54  ;;  %v1528_v16 = vsel %vm482_vm6, %v1524_v10, %v1526_v13  ;;  %v1539_v19 = vsel %vm43_vm1, %v1526_v13, 0  ;;  %v1527_v20 = vsel %vm482_vm6, %v1522_v5, %v1524_v10 }
  0xbc   :  { %2298 = vmatpush3.bf16.msra.mxu1 %v1101_v55  ;;  %2299 = vmatprep.mubr.msk.bf16.mxu1 %vm2394_vm0, %v2393_v8  ;;  %v1533_v22 = vsel %vm43_vm1, %v1527_v20, 0  ;;  %v2203_v55 = vld [vmem:[%s2838_s1 + $0x20] sm:$0xf] }
  0xbd   :  { %2303 = vmatprep.subr.bf16.mxu1 %v2393_v8 }
  0xbe   :  { %v1638_v15 = vpop.permute.xlu0 %1637  ;;  %v1640_v18 = vpop.permute.xlu1 %1639 }
  0xbf   :  { %v1643_v31 = vsel %vm600_vm7, %v1638_v15, %v1640_v18 }
  0xc0   :  { %2154 = vmatmul.mubr.msk.bf16.vlgmr.msra.gmra.mxu0 %vm39_vm2, %v2152_v54  ;;  %v1649_v33 = vsel %vm43_vm1, %v1643_v31, 0 }
  0xc1   :  { %1118 = vmatpush1.bf16.msra.mxu0 %v1095_v57  ;;  %1135 = vmatprep.mubr.bf16.mxu0 %v2395_v9 }
  0xc2   :  { %2162 = vmatprep.subr.msk.bf16.mxu0 %vm43_vm1, %v2510_v25  ;;  %v1078_v25 = vld [vmem:[%s2838_s1] sm:$0xf]  ;;  %v1642_v21 = vpop.permute.xlu0 %1641  ;;  %v1754_v23 = vpop.permute.xlu1 %1753  ;;  %s2402_s1 = smov [#allocation2]  }
  0xc3   :  { %2300 = vmatmul.mubr.msk.bf16.vlgmr.msra.gmra.mxu1 %vm39_vm2, %v2158_v59  ;;  %v1644_v26 = vsel %vm600_vm7, %v1640_v18, %v1642_v21  ;;  %v1655_v30 = vsel %vm43_vm1, %v1642_v21, 0  ;;  %s2110_s9 = sshll.u32 %s2402_s1, 4  ;;  %s2111_s9 = int_to_ptr.vmem [resolvable:$true] %s2110_s9 }
  0xc4   :  { %2304 = vmatpush3.bf16.msra.mxu1 %v1194_v61  ;;  %2305 = vmatprep.mubr.msk.bf16.mxu1 %vm2394_vm0, %v2393_v8  ;;  %s2369_s10 = scalar_lea.vmem %s2111_s9, 768  ;;  %p2374_p1 = scmp.lt.s32.totalorder %s2111_s9, %s2111_s9 }
  0xc5   :  { %2309 = vmatprep.subr.bf16.mxu1 %v2393_v8  ;;  %p2370_p0 = scmp.ne.s32.totalorder %s2111_s9, %s2369_s10  ;;  %p2375_p2 = scmp.lt.s32.totalorder %s2369_s10, %s2369_s10 }
  0xc6   :  { %v1756_v29 = vpop.permute.xlu0 %1755  ;;  %v1758_v32 = vpop.permute.xlu1 %1757 }
  0xc7   :  { %v1760_v35 = vsel %vm718_vm8, %v1756_v29, %v1758_v32  ;;  %v1771_v38 = vsel %vm43_vm1, %v1758_v32, 0  ;;  %v1759_v39 = vsel %vm718_vm8, %v1754_v23, %v1756_v29  ;;  %p2376_p3 = por %p2375_p2, %p2374_p1 }
  0xc8   :  { %2160 = vmatmul.mubr.msk.bf16.vlgmr.msra.gmra.mxu0 %vm39_vm2, %v2158_v59  ;;  %v1765_v41 = vsel %vm43_vm1, %v1759_v39, 0 }
  0xc9   :  { %1211 = vmatpush1.bf16.msra.mxu0 %v1188_v63  ;;  %1228 = vmatprep.mubr.bf16.mxu0 %v2395_v9  ;;  %p2377_p4 = pnand %p2376_p3, %p2370_p0 }
  0xca   :  { %2168 = vmatprep.subr.msk.bf16.mxu0 %vm43_vm1, %v1296_v1  ;;  %v1870_v34 = vpop.permute.xlu0 %1869  ;;  %v1872_v37 = vpop.permute.xlu1 %1871 }
  0xcb   :  { %2306 = vmatmul.mubr.msk.bf16.vlgmr.msra.gmra.mxu1 %vm39_vm2, %v1078_v25  ;;  %v1875_v46 = vsel %vm836_vm9, %v1870_v34, %v1872_v37 }
  0xcc   :  { %2310 = vmatpush3.bf16.msra.mxu1 %v1307_v2  ;;  %2311 = vmatprep.mubr.msk.bf16.mxu1 %vm2394_vm0, %v2393_v8  ;;  %v1881_v49 = vsel %vm43_vm1, %v1875_v46, 0 }
  0xcd   :  { %2315 = vmatprep.subr.bf16.mxu1 %v2393_v8 }
  0xce   :  { %v1874_v40 = vpop.permute.xlu0 %1873  ;;  %v1986_v42 = vpop.permute.xlu1 %1985 }
  0xcf   :  { %v1876_v43 = vsel %vm836_vm9, %v1872_v37, %v1874_v40  ;;  %v1887_v45 = vsel %vm43_vm1, %v1874_v40, 0 }
  0xd0   :  { %2163 = vmatmul.mubr.msk.bf16.vlgmr.msra.gmra.mxu0 %vm39_vm2, %v1078_v25 }
  0xd1   :  { %1324 = vmatpush1.bf16.msra.mxu0 %v1301_v4  ;;  %1341 = vmatprep.mubr.bf16.mxu0 %v2395_v9 }
  0xd2   :  { %2174 = vmatprep.subr.msk.bf16.mxu0 %vm43_vm1, %v1412_v6  ;;  %v1988_v47 = vpop.permute.xlu0 %1987  ;;  %v1990_v48 = vpop.permute.xlu1 %1989 }
  0xd3   :  { %2312 = vmatmul.mubr.msk.bf16.vlgmr.msra.gmra.mxu1 %vm39_vm2, %v2167_v7  ;;  %v1992_v50 = vsel %vm954_vm10, %v1988_v47, %v1990_v48  ;;  %v2003_v52 = vsel %vm43_vm1, %v1990_v48, 0  ;;  %v1991_v53 = vsel %vm954_vm10, %v1986_v42, %v1988_v47 }
  0xd4   :  { %2316 = vmatpush3.bf16.msra.mxu1 %v1423_v11  ;;  %2317 = vmatprep.mubr.msk.bf16.mxu1 %vm2394_vm0, %v2393_v8  ;;  %v1997_v54 = vsel %vm43_vm1, %v1991_v53, 0 }
  0xd5   :  { %2321 = vmatprep.subr.bf16.mxu1 %v2393_v8 }
  0xd8   :  { %2169 = vmatmul.mubr.msk.bf16.vlgmr.msra.gmra.mxu0 %vm39_vm2, %v2167_v7 }
  0xd9   :  { %1440 = vmatpush1.bf16.msra.mxu0 %v1417_v14  ;;  %1457 = vmatprep.mubr.bf16.mxu0 %v2395_v9 }
  0xda   :  { %2180 = vmatprep.subr.msk.bf16.mxu0 %vm43_vm1, %v1528_v16 }
  0xdb   :  { %2318 = vmatmul.mubr.msk.bf16.vlgmr.msra.gmra.mxu1 %vm39_vm2, %v2173_v17 }
  0xdc   :  { %2322 = vmatpush3.bf16.msra.mxu1 %v1539_v19  ;;  %2323 = vmatprep.mubr.msk.bf16.mxu1 %vm2394_vm0, %v2393_v8 }
  0xdd   :  { %2327 = vmatprep.subr.bf16.mxu1 %v2393_v8 }
  0xe0   :  { %2175 = vmatmul.mubr.msk.bf16.vlgmr.msra.gmra.mxu0 %vm39_vm2, %v2173_v17 }
  0xe1   :  { %1556 = vmatpush1.bf16.msra.mxu0 %v1533_v22  ;;  %1573 = vmatprep.mubr.bf16.mxu0 %v2395_v9 }
  0xe2   :  { %2186 = vmatprep.subr.msk.bf16.mxu0 %vm43_vm1, %v1644_v26 }
  0xe3   :  { %2324 = vmatmul.mubr.msk.bf16.vlgmr.msra.gmra.mxu1 %vm39_vm2, %v2179_v28 }
  0xe4   :  { %2328 = vmatpush3.bf16.msra.mxu1 %v1655_v30  ;;  %2329 = vmatprep.mubr.msk.bf16.mxu1 %vm2394_vm0, %v2393_v8 }
  0xe5   :  { %2333 = vmatprep.subr.bf16.mxu1 %v2393_v8 }
  0xe8   :  { %2181 = vmatmul.mubr.msk.bf16.vlgmr.msra.gmra.mxu0 %vm39_vm2, %v2179_v28 }
  0xe9   :  { %1672 = vmatpush1.bf16.msra.mxu0 %v1649_v33  ;;  %1689 = vmatprep.mubr.bf16.mxu0 %v2395_v9 }
  0xea   :  { %2192 = vmatprep.subr.msk.bf16.mxu0 %vm43_vm1, %v1760_v35 }
  0xeb   :  { %2330 = vmatmul.mubr.msk.bf16.vlgmr.msra.gmra.mxu1 %vm39_vm2, %v2185_v36 }
  0xec   :  { %2334 = vmatpush3.bf16.msra.mxu1 %v1771_v38  ;;  %2335 = vmatprep.mubr.msk.bf16.mxu1 %vm2394_vm0, %v2393_v8 }
  0xed   :  { %2339 = vmatprep.subr.bf16.mxu1 %v2393_v8 }
  0xf0   :  { %2187 = vmatmul.mubr.msk.bf16.vlgmr.msra.gmra.mxu0 %vm39_vm2, %v2185_v36 }
  0xf1   :  { %1788 = vmatpush1.bf16.msra.mxu0 %v1765_v41  ;;  %1805 = vmatprep.mubr.bf16.mxu0 %v2395_v9 }
  0xf2   :  { %2198 = vmatprep.subr.msk.bf16.mxu0 %vm43_vm1, %v1876_v43 }
  0xf3   :  { %2336 = vmatmul.mubr.msk.bf16.vlgmr.msra.gmra.mxu1 %vm39_vm2, %v2191_v44 }
  0xf4   :  { %2340 = vmatpush3.bf16.msra.mxu1 %v1887_v45  ;;  %2341 = vmatprep.mubr.msk.bf16.mxu1 %vm2394_vm0, %v2393_v8 }
  0xf5   :  { %2345 = vmatprep.subr.bf16.mxu1 %v2393_v8 }
  0xf8   :  { %2193 = vmatmul.mubr.msk.bf16.vlgmr.msra.gmra.mxu0 %vm39_vm2, %v2191_v44 }
  0xf9   :  { %1904 = vmatpush1.bf16.msra.mxu0 %v1881_v49  ;;  %1921 = vmatprep.mubr.bf16.mxu0 %v2395_v9 }
  0xfa   :  { %2204 = vmatprep.subr.msk.bf16.mxu0 %vm43_vm1, %v1992_v50 }
  0xfb   :  { %2342 = vmatmul.mubr.msk.bf16.vlgmr.msra.gmra.mxu1 %vm39_vm2, %v2197_v51 }
  0xfc   :  { %2346 = vmatpush3.bf16.msra.mxu1 %v2003_v52  ;;  %2347 = vmatprep.mubr.msk.bf16.mxu1 %vm2394_vm0, %v2393_v8 }
 0x100   :  { %2199 = vmatmul.mubr.msk.bf16.vlgmr.msra.gmra.mxu0 %vm39_vm2, %v2197_v51 }
 0x101   :  { %2020 = vmatpush1.bf16.msra.mxu0 %v1997_v54  ;;  %2037 = vmatprep.mubr.bf16.mxu0 %v2395_v9 }
 0x103   :  { %2348 = vmatmul.mubr.msk.bf16.vlgmr.msra.gmra.mxu1 %vm39_vm2, %v2203_v55 }
 0x108   :  { %2205 = vmatmul.mubr.msk.bf16.vlgmr.msra.gmra.mxu0 %vm39_vm2, %v2203_v55 }
 0x13b   :  { %v128_v56 = vpop.f32.mrf.mxu1 }
 0x13d   :  { %v2247_v57 = vpop.f32.mrf.mxu1 }
 0x13f   :  { %v131_v58 = vpop.f32.mrf.mxu1 }
 0x140   :  { %v87_v59 = vpop.f32.mrf.mxu0 }
 0x141   :  { %v2248_v8 = vpop.f32.mrf.mxu1 }
 0x142   :  { %v89_v60 = vpop.f32.mrf.mxu0 }
 0x143   :  { %v221_v61 = vpop.f32.mrf.mxu1 }
 0x144   :  { %v91_v62 = vpop.f32.mrf.mxu0  ;;  %v222_v41 = vadd.f32 %v221_v61, %v128_v56 }
 0x145   :  { %v2253_v63 = vpop.f32.mrf.mxu1 }
 0x146   :  { %v92_v0 = vpop.f32.mrf.mxu0 }
 0x147   :  { %v224_v1 = vpop.f32.mrf.mxu1 }
 0x148   :  { %v180_v25 = vpop.f32.mrf.mxu0 }
 0x149   :  { %v2254_v27 = vpop.f32.mrf.mxu1  ;;  %v181_v49 = vadd.f32 %v180_v25, %v87_v59 }
 0x14a   :  { %v182_v2 = vpop.f32.mrf.mxu0 }
 0x14b   :  { %v336_v3 = vpop.f32.mrf.mxu1  ;;  %v183_v53 = vadd.f32 %v182_v2, %v89_v60 }
 0x14c   :  { %v184_v9 = vpop.f32.mrf.mxu0  ;;  %v344_v44 = vadd.f32 %v336_v3, %v222_v41 }
 0x14d   :  { %v2259_v24 = vpop.f32.mrf.mxu1 }
 0x14e   :  { %v185_v4 = vpop.f32.mrf.mxu0 }
 0x14f   :  { %v339_v5 = vpop.f32.mrf.mxu1  ;;  %v1057_v4 = vpop.permute.xlu0 %1056 }
 0x150   :  { %v295_v6 = vpop.f32.mrf.mxu0 }
 0x151   :  { %v2260_v7 = vpop.f32.mrf.mxu1  ;;  %v342_v54 = vadd.f32 %v295_v6, %v181_v49 }
 0x152   :  { %v297_v10 = vpop.f32.mrf.mxu0 }
 0x153   :  { %v454_v11 = vpop.f32.mrf.mxu1  ;;  %v343_v8 = vadd.f32 %v297_v10, %v183_v53 }
 0x154   :  { %v299_v12 = vpop.f32.mrf.mxu0  ;;  %v462_v47 = vadd.f32 %v454_v11, %v344_v44 }
 0x155   :  { %v2265_v13 = vpop.f32.mrf.mxu1 }
 0x156   :  { %v300_v14 = vpop.f32.mrf.mxu0 }
 0x157   :  { %v457_v15 = vpop.f32.mrf.mxu1 }
 0x158   :  { %v413_v16 = vpop.f32.mrf.mxu0 }
 0x159   :  { %v2266_v17 = vpop.f32.mrf.mxu1  ;;  %v460_v62 = vadd.f32 %v413_v16, %v342_v54 }
 0x15a   :  { %v415_v18 = vpop.f32.mrf.mxu0 }
 0x15b   :  { %v572_v19 = vpop.f32.mrf.mxu1  ;;  %v461_v0 = vadd.f32 %v415_v18, %v343_v8 }
 0x15c   :  { %v417_v20 = vpop.f32.mrf.mxu0  ;;  %v580_v51 = vadd.f32 %v572_v19, %v462_v47 }
 0x15d   :  { %v2271_v21 = vpop.f32.mrf.mxu1 }
 0x15e   :  { %v418_v22 = vpop.f32.mrf.mxu0 }
 0x15f   :  { %v575_v23 = vpop.f32.mrf.mxu1 }
 0x160   :  { %v531_v26 = vpop.f32.mrf.mxu0 }
 0x161   :  { %v2272_v28 = vpop.f32.mrf.mxu1  ;;  %v578_v1 = vadd.f32 %v531_v26, %v460_v62 }
 0x162   :  { %v533_v29 = vpop.f32.mrf.mxu0 }
 0x163   :  { %v690_v30 = vpop.f32.mrf.mxu1  ;;  %v579_v24 = vadd.f32 %v533_v29, %v461_v0 }
 0x164   :  { %v535_v31 = vpop.f32.mrf.mxu0  ;;  %v698_v57 = vadd.f32 %v690_v30, %v580_v51 }
 0x165   :  { %v2277_v32 = vpop.f32.mrf.mxu1 }
 0x166   :  { %v536_v33 = vpop.f32.mrf.mxu0 }
 0x167   :  { %v693_v34 = vpop.f32.mrf.mxu1 }
 0x168   :  { %v649_v35 = vpop.f32.mrf.mxu0 }
 0x169   :  { %v2278_v36 = vpop.f32.mrf.mxu1  ;;  %v696_v59 = vadd.f32 %v649_v35, %v578_v1 }
 0x16a   :  { %v651_v37 = vpop.f32.mrf.mxu0 }
 0x16b   :  { %v808_v38 = vpop.f32.mrf.mxu1  ;;  %v697_v2 = vadd.f32 %v651_v37, %v579_v24 }
 0x16c   :  { %v653_v39 = vpop.f32.mrf.mxu0  ;;  %v816_v56 = vadd.f32 %v808_v38, %v698_v57 }
 0x16d   :  { %v2283_v40 = vpop.f32.mrf.mxu1 }
 0x16e   :  { %v654_v42 = vpop.f32.mrf.mxu0 }
 0x16f   :  { %v811_v43 = vpop.f32.mrf.mxu1 }
 0x170   :  { %v767_v45 = vpop.f32.mrf.mxu0 }
 0x171   :  { %v2284_v46 = vpop.f32.mrf.mxu1  ;;  %v814_v6 = vadd.f32 %v767_v45, %v696_v59 }
 0x172   :  { %v769_v48 = vpop.f32.mrf.mxu0 }
 0x173   :  { %v926_v50 = vpop.f32.mrf.mxu1  ;;  %v815_v12 = vadd.f32 %v769_v48, %v697_v2 }
 0x174   :  { %v771_v52 = vpop.f32.mrf.mxu0  ;;  %v934_v3 = vadd.f32 %v926_v50, %v816_v56 }
 0x175   :  { %v2289_v55 = vpop.f32.mrf.mxu1 }
 0x176   :  { %v772_v58 = vpop.f32.mrf.mxu0 }
 0x177   :  { %v929_v63 = vpop.f32.mrf.mxu1 }
 0x178   :  { %v885_v61 = vpop.f32.mrf.mxu0 }
 0x179   :  { %v2290_v27 = vpop.f32.mrf.mxu1  ;;  %v932_v13 = vadd.f32 %v885_v61, %v814_v6 }
 0x17a   :  { %v887_v9 = vpop.f32.mrf.mxu0 }
 0x17b   :  { %v1044_v25 = vpop.f32.mrf.mxu1  ;;  %v933_v17 = vadd.f32 %v887_v9, %v815_v12 }
 0x17c   :  { %v1052_v5 = vadd.f32 %v1044_v25, %v934_v3  ;;  %v889_v60 = vpop.f32.mrf.mxu0 }
 0x17d   :  { %v2295_v7 = vpop.f32.mrf.mxu1 }
 0x17e   :  { %v1061_v11 = vadd.f32 %v1057_v4, %v1052_v5  ;;  %v890_v10 = vpop.f32.mrf.mxu0 }
 0x17f   :  { %v1047_v14 = vpop.f32.mrf.mxu1 }
 0x180   :  { %v1064_v15 = vmax.f32 %v1061_v11, 0.0  ;;  %v1003_v16 = vpop.f32.mrf.mxu0 }
 0x181   :  { %v1050_v18 = vadd.f32 %v1003_v16, %v932_v13  ;;  %v2296_v19 = vpop.f32.mrf.mxu1 }
 0x182   :  { %1068 = vst.msk [vmem:[#allocation2 + $0x10] sm:$0xff] %vm1067_vm11, %v1064_v15  ;;  %v1005_v20 = vpop.f32.mrf.mxu0 }
 0x183   :  { %v1059_v21 = vadd.f32 %v1057_v4, %v1050_v18  ;;  %v1051_v22 = vadd.f32 %v1005_v20, %v933_v17  ;;  %v1178_v23 = vpop.f32.mrf.mxu1 }
 0x184   :  { %v1007_v26 = vpop.f32.mrf.mxu0 }
 0x185   :  { %v1062_v28 = vmax.f32 %v1059_v21, 0.0  ;;  %v1060_v29 = vadd.f32 %v1057_v4, %v1051_v22  ;;  %v2301_v30 = vpop.f32.mrf.mxu1 }
 0x186   :  { %v1008_v31 = vpop.f32.mrf.mxu0 }
 0x187   :  { %1065 = vst [vmem:[#allocation2] sm:$0xff] %v1062_v28  ;;  %v1063_v32 = vmax.f32 %v1060_v29, 0.0  ;;  %v1181_v33 = vpop.f32.mrf.mxu1 }
 0x188   :  { %v1137_v34 = vpop.f32.mrf.mxu0 }
 0x189   :  { %1066 = vst [vmem:[#allocation2 + $0x8] sm:$0xff] %v1063_v32  ;;  %v2302_v35 = vpop.f32.mrf.mxu1 }
 0x18a   :  { %v1139_v36 = vpop.f32.mrf.mxu0 }
 0x18b   :  { %v1271_v37 = vpop.f32.mrf.mxu1 }
 0x18c   :  { %v1141_v38 = vpop.f32.mrf.mxu0  ;;  %v1272_v13 = vadd.f32 %v1271_v37, %v1178_v23 }
 0x18d   :  { %v2307_v39 = vpop.f32.mrf.mxu1 }
 0x18e   :  { %v1142_v40 = vpop.f32.mrf.mxu0 }
 0x18f   :  { %v1274_v41 = vpop.f32.mrf.mxu1 }
 0x190   :  { %v1230_v42 = vpop.f32.mrf.mxu0 }
 0x191   :  { %v2308_v43 = vpop.f32.mrf.mxu1  ;;  %v1231_v21 = vadd.f32 %v1230_v42, %v1137_v34 }
 0x192   :  { %v1232_v44 = vpop.f32.mrf.mxu0 }
 0x193   :  { %v1384_v45 = vpop.f32.mrf.mxu1  ;;  %v1233_v29 = vadd.f32 %v1232_v44, %v1139_v36 }
 0x194   :  { %v1234_v46 = vpop.f32.mrf.mxu0  ;;  %v1392_v16 = vadd.f32 %v1384_v45, %v1272_v13 }
 0x195   :  { %v2313_v47 = vpop.f32.mrf.mxu1 }
 0x196   :  { %v1235_v48 = vpop.f32.mrf.mxu0 }
 0x197   :  { %v1387_v49 = vpop.f32.mrf.mxu1  ;;  %v2093_v48 = vpop.permute.xlu1 %2092 }
 0x198   :  { %v1343_v50 = vpop.f32.mrf.mxu0 }
 0x199   :  { %v2314_v51 = vpop.f32.mrf.mxu1  ;;  %v1390_v30 = vadd.f32 %v1343_v50, %v1231_v21 }
 0x19a   :  { %v1345_v52 = vpop.f32.mrf.mxu0 }
 0x19b   :  { %v1500_v53 = vpop.f32.mrf.mxu1  ;;  %v1391_v35 = vadd.f32 %v1345_v52, %v1233_v29 }
 0x19c   :  { %v1347_v54 = vpop.f32.mrf.mxu0  ;;  %v1508_v19 = vadd.f32 %v1500_v53, %v1392_v16 }
 0x19d   :  { %v2319_v55 = vpop.f32.mrf.mxu1 }
 0x19e   :  { %v1348_v57 = vpop.f32.mrf.mxu0 }
 0x19f   :  { %v1503_v58 = vpop.f32.mrf.mxu1 }
 0x1a0   :  { %v1459_v8 = vpop.f32.mrf.mxu0 }
 0x1a1   :  { %v2320_v62 = vpop.f32.mrf.mxu1  ;;  %v1506_v38 = vadd.f32 %v1459_v8, %v1390_v30 }
 0x1a2   :  { %v1461_v63 = vpop.f32.mrf.mxu0 }
 0x1a3   :  { %v1616_v56 = vpop.f32.mrf.mxu1  ;;  %v1507_v40 = vadd.f32 %v1461_v63, %v1391_v35 }
 0x1a4   :  { %v1463_v61 = vpop.f32.mrf.mxu0  ;;  %v1624_v26 = vadd.f32 %v1616_v56, %v1508_v19 }
 0x1a5   :  { %v2325_v0 = vpop.f32.mrf.mxu1 }
 0x1a6   :  { %v1464_v1 = vpop.f32.mrf.mxu0 }
 0x1a7   :  { %v1619_v27 = vpop.f32.mrf.mxu1 }
 0x1a8   :  { %v1575_v3 = vpop.f32.mrf.mxu0 }
 0x1a9   :  { %v2326_v9 = vpop.f32.mrf.mxu1  ;;  %v1622_v41 = vadd.f32 %v1575_v3, %v1506_v38 }
 0x1aa   :  { %v1577_v24 = vpop.f32.mrf.mxu0 }
 0x1ab   :  { %v1732_v59 = vpop.f32.mrf.mxu1  ;;  %v1623_v47 = vadd.f32 %v1577_v24, %v1507_v40 }
 0x1ac   :  { %v1579_v25 = vpop.f32.mrf.mxu0  ;;  %v1740_v32 = vadd.f32 %v1732_v59, %v1624_v26 }
 0x1ad   :  { %v2331_v4 = vpop.f32.mrf.mxu1 }
 0x1ae   :  { %v1580_v5 = vpop.f32.mrf.mxu0 }
 0x1af   :  { %v1735_v60 = vpop.f32.mrf.mxu1 }
 0x1b0   :  { %v1691_v2 = vpop.f32.mrf.mxu0 }
 0x1b1   :  { %v2332_v6 = vpop.f32.mrf.mxu1  ;;  %v1738_v34 = vadd.f32 %v1691_v2, %v1622_v41 }
 0x1b2   :  { %v1693_v7 = vpop.f32.mrf.mxu0 }
 0x1b3   :  { %v1848_v11 = vpop.f32.mrf.mxu1  ;;  %v1739_v44 = vadd.f32 %v1693_v7, %v1623_v47 }
 0x1b4   :  { %v1695_v10 = vpop.f32.mrf.mxu0  ;;  %v1856_v23 = vadd.f32 %v1848_v11, %v1740_v32 }
 0x1b5   :  { %v2337_v12 = vpop.f32.mrf.mxu1 }
 0x1b6   :  { %v1696_v14 = vpop.f32.mrf.mxu0 }
 0x1b7   :  { %v1851_v15 = vpop.f32.mrf.mxu1 }
 0x1b8   :  { %v1807_v17 = vpop.f32.mrf.mxu0 }
 0x1b9   :  { %v2338_v18 = vpop.f32.mrf.mxu1  ;;  %v1854_v50 = vadd.f32 %v1807_v17, %v1738_v34 }
 0x1ba   :  { %v1809_v20 = vpop.f32.mrf.mxu0 }
 0x1bb   :  { %v1964_v22 = vpop.f32.mrf.mxu1  ;;  %v1855_v54 = vadd.f32 %v1809_v20, %v1739_v44 }
 0x1bc   :  { %v1811_v28 = vpop.f32.mrf.mxu0  ;;  %v1972_v45 = vadd.f32 %v1964_v22, %v1856_v23 }
 0x1bd   :  { %v2343_v31 = vpop.f32.mrf.mxu1 }
 0x1be   :  { %v1812_v33 = vpop.f32.mrf.mxu0 }
 0x1bf   :  { %v1967_v39 = vpop.f32.mrf.mxu1 }
 0x1c0   :  { %v1923_v37 = vpop.f32.mrf.mxu0 }
 0x1c1   :  { %v2344_v43 = vpop.f32.mrf.mxu1  ;;  %v1970_v55 = vadd.f32 %v1923_v37, %v1854_v50 }
 0x1c2   :  { %v1925_v46 = vpop.f32.mrf.mxu0 }
 0x1c3   :  { %v2080_v42 = vpop.f32.mrf.mxu1  ;;  %v1971_v62 = vadd.f32 %v1925_v46, %v1855_v54 }
 0x1c4   :  { %v2088_v49 = vadd.f32 %v2080_v42, %v1972_v45  ;;  %v1927_v36 = vpop.f32.mrf.mxu0 }
 0x1c5   :  { %v2349_v51 = vpop.f32.mrf.mxu1 }
 0x1c6   :  { %v2097_v53 = vadd.f32 %v2093_v48, %v2088_v49  ;;  %v1928_v52 = vpop.f32.mrf.mxu0 }
 0x1c7   :  { %v2083_v57 = vpop.f32.mrf.mxu1 }
 0x1c8   :  { %v2100_v58 = vmax.f32 %v2097_v53, 0.0  ;;  %v2039_v8 = vpop.f32.mrf.mxu0 }
 0x1c9   :  { %v2086_v63 = vadd.f32 %v2039_v8, %v1970_v55  ;;  %v2350_v56 = vpop.f32.mrf.mxu1 }
 0x1ca   :  { %2104 = vst.msk [vmem:[#allocation2 + $0x28] sm:$0xff] %vm1067_vm11, %v2100_v58  ;;  %v2041_v61 = vpop.f32.mrf.mxu0 }
 0x1cb   :  { %v2095_v0 = vadd.f32 %v2093_v48, %v2086_v63  ;;  %v2087_v1 = vadd.f32 %v2041_v61, %v1971_v62 }
 0x1cc   :  { %v2043_v27 = vpop.f32.mrf.mxu0 }
 0x1cd   :  { %v2098_v3 = vmax.f32 %v2095_v0, 0.0  ;;  %v2096_v9 = vadd.f32 %v2093_v48, %v2087_v1 }
 0x1ce   :  { %v2044_v24 = vpop.f32.mrf.mxu0 }
 0x1cf   :  { %2102 = vst [vmem:[#allocation2 + $0x18] sm:$0xff] %v2098_v3  ;;  %v2099_v59 = vmax.f32 %v2096_v9, 0.0 }
 0x1d1   :  { %2103 = vst [vmem:[#allocation2 + $0x20] sm:$0xff] %v2099_v59 }
 0x1d2   :  { %2380 = shalt.err (!%p2377_p4)
}
 0x1d3   :  { %s2403_s11 = smov 384   ;;  %s2404_s12 = smov 24  }
 0x1d4   :  { %2116 = dma.vmem_to_hbm [thread:$0]  %s2111_s9, 768, %s2840_s3, [#allocation3], %s2403_s11, %s2403_s11, %s2404_s12  }
 0x1d5   :  { %2389 = dma.done.wait [#allocation3], 768  }
 0x1d6   :  { %2390 = vsyncadd [#allocation3], 4294966528 }
 0x1d7   :  { %2120 = vsyncpa [#allocation3], 1 }

</bundles_post_ra>
